<compile_context>
chip_gen: v7x
topology: tpu7x:2x2x1
jax: 0.10.0
libtpu: 0.0.40
codegen_flags: <defaults>
</compile_context>

<pallas_src>
import functools

import jax
import jax.numpy as jnp
import numpy as np
from jax.experimental import pallas as pl
from jax.experimental.pallas import tpu as pltpu


def _center_rotate_kernel(x_ref, o_ref, *, patch, center_h, center_w):
    """Process one (H, W) channel image per grid step.

    x_ref / o_ref: (H, W) VMEM tiles (lane-dense along W).
    Bulk of the image is a straight lane-dense copy; only the statically
    known central patches get an intra-patch (P, P) transpose.
    """
    # Lane-dense identity copy of the whole channel image (full-width stores).
    o_ref[...] = x_ref[...]

    # Statically unrolled transposes of the central patches (indices are
    # Python ints known at trace time -> straight-line code, XLU transposes).
    for gh in center_h:
        r0 = gh * patch
        for gw in center_w:
            c0 = gw * patch
            o_ref[r0:r0 + patch, c0:c0 + patch] = (
                x_ref[r0:r0 + patch, c0:c0 + patch].T
            )


class PatchEmbedCenterRotate:
    """JAX/Pallas port of Patch_Embed_Center_Rotate (no learnable params)."""

    def __init__(self, img_size=224, patch_size=16, in_chans=3):
        ih, iw = img_size if isinstance(img_size, tuple) else (img_size, img_size)
        ph, pw = patch_size if isinstance(patch_size, tuple) else (patch_size, patch_size)
        assert ph == pw, "square patches assumed (as in the torch module usage)"
        self.patch_size = ph
        self.grid_size = (ih // ph, iw // pw)
        self.num_patches = self.grid_size[0] * self.grid_size[1]
        # NOTE: the torch module defines no parameters, so nothing to init.

    def __call__(self, x):
        B, C, H, W = x.shape
        P = self.patch_size
        GH, GW = H // P, W // P
        assert GH * P == H and GW * P == W, "H and W must be divisible by patch_size"

        # Static (trace-time) central-patch indices.  Exact integer form of
        # the torch real-valued inclusive bounds:
        #   keep j  <=>  j >= GW/3 and j <= 2*GW/3  <=>  GW <= 3*j <= 2*GW
        center_h = tuple(g for g in range(GH) if GH <= 3 * g <= 2 * GH)
        center_w = tuple(g for g in range(GW) if GW <= 3 * g <= 2 * GW)

        kernel = functools.partial(
            _center_rotate_kernel, patch=P, center_h=center_h, center_w=center_w
        )

        return pl.pallas_call(
            kernel,
            out_shape=jax.ShapeDtypeStruct(x.shape, x.dtype),
            grid=(B, C),
            in_specs=[
                pl.BlockSpec((None, None, H, W), lambda b, c: (b, c, 0, 0))
            ],
            out_specs=pl.BlockSpec((None, None, H, W), lambda b, c: (b, c, 0, 0)),
            compiler_params=pltpu.CompilerParams(
                dimension_semantics=("parallel", "parallel")
            ),
        )(x)


def ref_forward_numpy(x, patch_size):
    """Pure-numpy replica of the torch forward (rearrange + center_rotate)."""
    B, C, Himg, Wimg = x.shape
    P = patch_size
    GH, GW = Himg // P, Wimg // P
    # 'b c (h p1) (w p2) -> b w h p1 p2 c'
    xr = x.reshape(B, C, GH, P, GW, P).transpose(0, 4, 2, 3, 5, 1).copy()
    # center_rotate: x shape (B, W, H, P1, P2, C)
    Bn, Wn, Hn = xr.shape[0], xr.shape[1], xr.shape[2]
    for i in range(Bn):
        for j in range(Wn):
            if j < Wn / 3 or j > Wn * 2 / 3:
                continue
            for k in range(Hn):
                if k < Hn / 3 or k > Hn * 2 / 3:
                    continue
                xr[i, j, k] = np.transpose(xr[i, j, k], (1, 0, 2))
    # 'b w h p2 p1 c -> b c (h p2) (w p1)'
    out = xr.transpose(0, 5, 2, 3, 1, 4).reshape(B, C, GH * P, GW * P)
    return out


if __name__ == "__main__":
    key = jax.random.PRNGKey(0)

    configs = [
        # (B, C, IMG, P)
        (2, 3, 24, 4),   # 6x6 patch grid, 3x3 central patches rotated
        (2, 4, 16, 4),   # 4x4 patch grid, single central patch rotated
    ]
    for B, C, IMG, P in configs:
        key, sub = jax.random.split(key)
        x = jax.random.normal(sub, (B, C, IMG, IMG), dtype=jnp.float32)

        module = PatchEmbedCenterRotate(img_size=IMG, patch_size=P, in_chans=C)
        y = jax.block_until_ready(module(x))

        y_ref = ref_forward_numpy(np.asarray(x), P)
        assert y.shape == x.shape and y.dtype == x.dtype
        np.testing.assert_allclose(np.asarray(y), y_ref, rtol=0, atol=0)

    print("KERNEL_OK")
</pallas_src>

<mosaic_0001>
module attributes {stable_mosaic.version = 11 : i64} {
  func.func @_center_rotate_kernel(%arg0: i32, %arg1: i32, %arg2: memref<1x1x24x24xf32, #tpu.memory_space<vmem>>, %arg3: memref<1x1x24x24xf32, #tpu.memory_space<vmem>>) attributes {dimension_semantics = [#tpu.dimension_semantics<parallel>, #tpu.dimension_semantics<parallel>], iteration_bounds = array<i64: 2, 3>, scalar_prefetch = 0 : i64, scratch_operands = 0 : i64, tpu.core_type = #tpu.core_type<tc>, window_params = [{transform_indices = @transform_0, window_bounds = array<i64: 1, 1, 24, 24>}, {transform_indices = @transform_1, window_bounds = array<i64: 1, 1, 24, 24>}]} {
    %c0 = arith.constant 0 : index
    %c0_0 = arith.constant 0 : index
    %c0_1 = arith.constant 0 : index
    %c0_2 = arith.constant 0 : index
    %0 = vector.load %arg2[%c0, %c0_0, %c0_1, %c0_2] : memref<1x1x24x24xf32, #tpu.memory_space<vmem>>, vector<1x1x24x24xf32>
    %1 = vector.shape_cast %0 : vector<1x1x24x24xf32> to vector<24x24xf32>
    %c0_3 = arith.constant 0 : index
    %c0_4 = arith.constant 0 : index
    %c0_5 = arith.constant 0 : index
    %c0_6 = arith.constant 0 : index
    %2 = vector.load %arg3[%c0_3, %c0_4, %c0_5, %c0_6] : memref<1x1x24x24xf32, #tpu.memory_space<vmem>>, vector<1x1x24x24xf32>
    %3 = vector.shape_cast %2 : vector<1x1x24x24xf32> to vector<24x24xf32>
    %4 = vector.shape_cast %1 : vector<24x24xf32> to vector<1x1x24x24xf32>
    tpu.vector_store %arg3[%c0_3, %c0_4, %c0_5, %c0_6], %4 {strides = array<i32>} : memref<1x1x24x24xf32, #tpu.memory_space<vmem>>, vector<1x1x24x24xf32>,
    %c0_7 = arith.constant 0 : index
    %c0_8 = arith.constant 0 : index
    %c8 = arith.constant 8 : index
    %c8_9 = arith.constant 8 : index
    %5 = vector.load %arg2[%c0_7, %c0_8, %c8, %c8_9] : memref<1x1x24x24xf32, #tpu.memory_space<vmem>>, vector<1x1x4x4xf32>
    %6 = vector.shape_cast %5 : vector<1x1x4x4xf32> to vector<4x4xf32>
    %7 = tpu.transpose %6, [1, 0] : vector<4x4xf32> -> vector<4x4xf32>
    %c0_10 = arith.constant 0 : index
    %c0_11 = arith.constant 0 : index
    %c8_12 = arith.constant 8 : index
    %c8_13 = arith.constant 8 : index
    %8 = vector.load %arg3[%c0_10, %c0_11, %c8_12, %c8_13] : memref<1x1x24x24xf32, #tpu.memory_space<vmem>>, vector<1x1x4x4xf32>
    %9 = vector.shape_cast %8 : vector<1x1x4x4xf32> to vector<4x4xf32>
    %10 = vector.shape_cast %7 : vector<4x4xf32> to vector<1x1x4x4xf32>
    tpu.vector_store %arg3[%c0_10, %c0_11, %c8_12, %c8_13], %10 {strides = array<i32>} : memref<1x1x24x24xf32, #tpu.memory_space<vmem>>, vector<1x1x4x4xf32>,
    %c0_14 = arith.constant 0 : index
    %c0_15 = arith.constant 0 : index
    %c8_16 = arith.constant 8 : index
    %c12 = arith.constant 12 : index
    %11 = vector.load %arg2[%c0_14, %c0_15, %c8_16, %c12] : memref<1x1x24x24xf32, #tpu.memory_space<vmem>>, vector<1x1x4x4xf32>
    %12 = vector.shape_cast %11 : vector<1x1x4x4xf32> to vector<4x4xf32>
    %13 = tpu.transpose %12, [1, 0] : vector<4x4xf32> -> vector<4x4xf32>
    %c0_17 = arith.constant 0 : index
    %c0_18 = arith.constant 0 : index
    %c8_19 = arith.constant 8 : index
    %c12_20 = arith.constant 12 : index
    %14 = vector.load %arg3[%c0_17, %c0_18, %c8_19, %c12_20] : memref<1x1x24x24xf32, #tpu.memory_space<vmem>>, vector<1x1x4x4xf32>
    %15 = vector.shape_cast %14 : vector<1x1x4x4xf32> to vector<4x4xf32>
    %16 = vector.shape_cast %13 : vector<4x4xf32> to vector<1x1x4x4xf32>
    tpu.vector_store %arg3[%c0_17, %c0_18, %c8_19, %c12_20], %16 {strides = array<i32>} : memref<1x1x24x24xf32, #tpu.memory_space<vmem>>, vector<1x1x4x4xf32>,
    %c0_21 = arith.constant 0 : index
    %c0_22 = arith.constant 0 : index
    %c8_23 = arith.constant 8 : index
    %c16 = arith.constant 16 : index
    %17 = vector.load %arg2[%c0_21, %c0_22, %c8_23, %c16] : memref<1x1x24x24xf32, #tpu.memory_space<vmem>>, vector<1x1x4x4xf32>
    %18 = vector.shape_cast %17 : vector<1x1x4x4xf32> to vector<4x4xf32>
    %19 = tpu.transpose %18, [1, 0] : vector<4x4xf32> -> vector<4x4xf32>
    %c0_24 = arith.constant 0 : index
    %c0_25 = arith.constant 0 : index
    %c8_26 = arith.constant 8 : index
    %c16_27 = arith.constant 16 : index
    %20 = vector.load %arg3[%c0_24, %c0_25, %c8_26, %c16_27] : memref<1x1x24x24xf32, #tpu.memory_space<vmem>>, vector<1x1x4x4xf32>
    %21 = vector.shape_cast %20 : vector<1x1x4x4xf32> to vector<4x4xf32>
    %22 = vector.shape_cast %19 : vector<4x4xf32> to vector<1x1x4x4xf32>
    tpu.vector_store %arg3[%c0_24, %c0_25, %c8_26, %c16_27], %22 {strides = array<i32>} : memref<1x1x24x24xf32, #tpu.memory_space<vmem>>, vector<1x1x4x4xf32>,
    %c0_28 = arith.constant 0 : index
    %c0_29 = arith.constant 0 : index
    %c12_30 = arith.constant 12 : index
    %c8_31 = arith.constant 8 : index
    %23 = vector.load %arg2[%c0_28, %c0_29, %c12_30, %c8_31] : memref<1x1x24x24xf32, #tpu.memory_space<vmem>>, vector<1x1x4x4xf32>
    %24 = vector.shape_cast %23 : vector<1x1x4x4xf32> to vector<4x4xf32>
    %25 = tpu.transpose %24, [1, 0] : vector<4x4xf32> -> vector<4x4xf32>
    %c0_32 = arith.constant 0 : index
    %c0_33 = arith.constant 0 : index
    %c12_34 = arith.constant 12 : index
    %c8_35 = arith.constant 8 : index
    %26 = vector.load %arg3[%c0_32, %c0_33, %c12_34, %c8_35] : memref<1x1x24x24xf32, #tpu.memory_space<vmem>>, vector<1x1x4x4xf32>
    %27 = vector.shape_cast %26 : vector<1x1x4x4xf32> to vector<4x4xf32>
    %28 = vector.shape_cast %25 : vector<4x4xf32> to vector<1x1x4x4xf32>
    tpu.vector_store %arg3[%c0_32, %c0_33, %c12_34, %c8_35], %28 {strides = array<i32>} : memref<1x1x24x24xf32, #tpu.memory_space<vmem>>, vector<1x1x4x4xf32>,
    %c0_36 = arith.constant 0 : index
    %c0_37 = arith.constant 0 : index
    %c12_38 = arith.constant 12 : index
    %c12_39 = arith.constant 12 : index
    %29 = vector.load %arg2[%c0_36, %c0_37, %c12_38, %c12_39] : memref<1x1x24x24xf32, #tpu.memory_space<vmem>>, vector<1x1x4x4xf32>
    %30 = vector.shape_cast %29 : vector<1x1x4x4xf32> to vector<4x4xf32>
    %31 = tpu.transpose %30, [1, 0] : vector<4x4xf32> -> vector<4x4xf32>
    %c0_40 = arith.constant 0 : index
    %c0_41 = arith.constant 0 : index
    %c12_42 = arith.constant 12 : index
    %c12_43 = arith.constant 12 : index
    %32 = vector.load %arg3[%c0_40, %c0_41, %c12_42, %c12_43] : memref<1x1x24x24xf32, #tpu.memory_space<vmem>>, vector<1x1x4x4xf32>
    %33 = vector.shape_cast %32 : vector<1x1x4x4xf32> to vector<4x4xf32>
    %34 = vector.shape_cast %31 : vector<4x4xf32> to vector<1x1x4x4xf32>
    tpu.vector_store %arg3[%c0_40, %c0_41, %c12_42, %c12_43], %34 {strides = array<i32>} : memref<1x1x24x24xf32, #tpu.memory_space<vmem>>, vector<1x1x4x4xf32>,
    %c0_44 = arith.constant 0 : index
    %c0_45 = arith.constant 0 : index
    %c12_46 = arith.constant 12 : index
    %c16_47 = arith.constant 16 : index
    %35 = vector.load %arg2[%c0_44, %c0_45, %c12_46, %c16_47] : memref<1x1x24x24xf32, #tpu.memory_space<vmem>>, vector<1x1x4x4xf32>
    %36 = vector.shape_cast %35 : vector<1x1x4x4xf32> to vector<4x4xf32>
    %37 = tpu.transpose %36, [1, 0] : vector<4x4xf32> -> vector<4x4xf32>
    %c0_48 = arith.constant 0 : index
    %c0_49 = arith.constant 0 : index
    %c12_50 = arith.constant 12 : index
    %c16_51 = arith.constant 16 : index
    %38 = vector.load %arg3[%c0_48, %c0_49, %c12_50, %c16_51] : memref<1x1x24x24xf32, #tpu.memory_space<vmem>>, vector<1x1x4x4xf32>
    %39 = vector.shape_cast %38 : vector<1x1x4x4xf32> to vector<4x4xf32>
    %40 = vector.shape_cast %37 : vector<4x4xf32> to vector<1x1x4x4xf32>
    tpu.vector_store %arg3[%c0_48, %c0_49, %c12_50, %c16_51], %40 {strides = array<i32>} : memref<1x1x24x24xf32, #tpu.memory_space<vmem>>, vector<1x1x4x4xf32>,
    %c0_52 = arith.constant 0 : index
    %c0_53 = arith.constant 0 : index
    %c16_54 = arith.constant 16 : index
    %c8_55 = arith.constant 8 : index
    %41 = vector.load %arg2[%c0_52, %c0_53, %c16_54, %c8_55] : memref<1x1x24x24xf32, #tpu.memory_space<vmem>>, vector<1x1x4x4xf32>
    %42 = vector.shape_cast %41 : vector<1x1x4x4xf32> to vector<4x4xf32>
    %43 = tpu.transpose %42, [1, 0] : vector<4x4xf32> -> vector<4x4xf32>
    %c0_56 = arith.constant 0 : index
    %c0_57 = arith.constant 0 : index
    %c16_58 = arith.constant 16 : index
    %c8_59 = arith.constant 8 : index
    %44 = vector.load %arg3[%c0_56, %c0_57, %c16_58, %c8_59] : memref<1x1x24x24xf32, #tpu.memory_space<vmem>>, vector<1x1x4x4xf32>
    %45 = vector.shape_cast %44 : vector<1x1x4x4xf32> to vector<4x4xf32>
    %46 = vector.shape_cast %43 : vector<4x4xf32> to vector<1x1x4x4xf32>
    tpu.vector_store %arg3[%c0_56, %c0_57, %c16_58, %c8_59], %46 {strides = array<i32>} : memref<1x1x24x24xf32, #tpu.memory_space<vmem>>, vector<1x1x4x4xf32>,
    %c0_60 = arith.constant 0 : index
    %c0_61 = arith.constant 0 : index
    %c16_62 = arith.constant 16 : index
    %c12_63 = arith.constant 12 : index
    %47 = vector.load %arg2[%c0_60, %c0_61, %c16_62, %c12_63] : memref<1x1x24x24xf32, #tpu.memory_space<vmem>>, vector<1x1x4x4xf32>
    %48 = vector.shape_cast %47 : vector<1x1x4x4xf32> to vector<4x4xf32>
    %49 = tpu.transpose %48, [1, 0] : vector<4x4xf32> -> vector<4x4xf32>
    %c0_64 = arith.constant 0 : index
    %c0_65 = arith.constant 0 : index
    %c16_66 = arith.constant 16 : index
    %c12_67 = arith.constant 12 : index
    %50 = vector.load %arg3[%c0_64, %c0_65, %c16_66, %c12_67] : memref<1x1x24x24xf32, #tpu.memory_space<vmem>>, vector<1x1x4x4xf32>
    %51 = vector.shape_cast %50 : vector<1x1x4x4xf32> to vector<4x4xf32>
    %52 = vector.shape_cast %49 : vector<4x4xf32> to vector<1x1x4x4xf32>
    tpu.vector_store %arg3[%c0_64, %c0_65, %c16_66, %c12_67], %52 {strides = array<i32>} : memref<1x1x24x24xf32, #tpu.memory_space<vmem>>, vector<1x1x4x4xf32>,
    %c0_68 = arith.constant 0 : index
    %c0_69 = arith.constant 0 : index
    %c16_70 = arith.constant 16 : index
    %c16_71 = arith.constant 16 : index
    %53 = vector.load %arg2[%c0_68, %c0_69, %c16_70, %c16_71] : memref<1x1x24x24xf32, #tpu.memory_space<vmem>>, vector<1x1x4x4xf32>
    %54 = vector.shape_cast %53 : vector<1x1x4x4xf32> to vector<4x4xf32>
    %55 = tpu.transpose %54, [1, 0] : vector<4x4xf32> -> vector<4x4xf32>
    %c0_72 = arith.constant 0 : index
    %c0_73 = arith.constant 0 : index
    %c16_74 = arith.constant 16 : index
    %c16_75 = arith.constant 16 : index
    %56 = vector.load %arg3[%c0_72, %c0_73, %c16_74, %c16_75] : memref<1x1x24x24xf32, #tpu.memory_space<vmem>>, vector<1x1x4x4xf32>
    %57 = vector.shape_cast %56 : vector<1x1x4x4xf32> to vector<4x4xf32>
    %58 = vector.shape_cast %55 : vector<4x4xf32> to vector<1x1x4x4xf32>
    tpu.vector_store %arg3[%c0_72, %c0_73, %c16_74, %c16_75], %58 {strides = array<i32>} : memref<1x1x24x24xf32, #tpu.memory_space<vmem>>, vector<1x1x4x4xf32>,
    return
  }
  func.func @transform_0(%arg0: i32, %arg1: i32) -> (i32, i32, i32, i32) {
    %c0_i32 = arith.constant 0 : i32
    %c0_i32_0 = arith.constant 0 : i32
    %c0_i32_1 = arith.constant 0 : i32
    return %arg0, %arg1, %c0_i32, %c0_i32_0 : i32, i32, i32, i32
  }
  func.func @transform_1(%arg0: i32, %arg1: i32) -> (i32, i32, i32, i32) {
    %c0_i32 = arith.constant 0 : i32
    %c0_i32_0 = arith.constant 0 : i32
    %c0_i32_1 = arith.constant 0 : i32
    return %arg0, %arg1, %c0_i32, %c0_i32_0 : i32, i32, i32, i32
  }
}

</mosaic_0001>

<bundles_post_ra>
// kernel: tpu_custom_call.1
= control target key start
LH: loop header
LB: loop body
LE: loop exit
PB: predicated region body
PF: predicated region fallthrough
CT: control target
= control target key end

     0   :  { %6 = vsyncpa [#allocation3], 0  ;;  %s1148_s0 = inlined_call_operand.hbm [shape: f32[2,3,24,24], index: 0, kind: input, shape index: {}]   ;;  %s1149_s1 = inlined_call_operand.hbm [shape: f32[2,3,24,24], index: 1, kind: output, shape index: {}]  }
   0x1   :  { %8 = vsyncpa [#allocation3 + $0x1], 0 }
   0x2   :  { %9 = vsyncpa [#allocation4], 0 }
   0x3   :  { %11 = vsyncpa [#allocation4 + $0x1], 0  ;;  %s901_s6 = smov 0   ;;  %s903_s7 = smov 0  }
   0x4   :  { %s905_s8 = smov 0   ;;  %s907_s9 = smov 0  }
   0x5   :  { %s909_s10 = smov 0   ;;  %s911_s11 = smov 0  }
   0x6   :  { %s913_s12 = smov 0   ;;  %s915_s13 = smov 0  }
   0x7 LB: > { %s647_s14 = sadd.s32 4294967295, %s878_s13   ;;  %s648_s15 = sadd.s32 4294967294, %s878_s13   ;;  %s878_s13 = sphi %s915_s13, %s17_s13   ;;  %s874_s12 = sphi %s913_s12, %s1164_s12   ;;  %s870_s11 = sphi %s911_s11, %s1163_s11   ;;  %s866_s10 = sphi %s909_s10, %s1162_s10   ;;  %s862_s9 = sphi %s907_s9, %s1161_s9   ;;  %s858_s8 = sphi %s905_s8, %s1160_s8   ;;  %s854_s7 = sphi %s903_s7, %s1159_s7   ;;  %s850_s6 = sphi %s901_s6, %s1158_s6  }
   0x8   : > { %s26_s16 = sadd.s32 1, %s870_s11  ;;  %s29_s17 = sadd.s32 1, %s874_s12 }
   0x9   : > { %p27_p0 = scmp.ge.s32.totalorder %s26_s16, 3  ;;  %s38_s18 = sadd.s32 1, %s858_s8 }
   0xa   : > { %p45_p1 = scmp.ne.s32.totalorder %s858_s8, %s854_s7  ;;  %p46_p2 = scmp.eq.s32.totalorder %s878_s13, 0 }
   0xb   : > { %s1166_s16 = smov (%p27_p0, %s26_s16), 0  ;;  %s1168_s17 = smov (!%p27_p0, %s29_s17), %s874_s12 }
   0xc   : > { %s34_s19 = ssub.s32 %s870_s11, %s1166_s16  ;;  %p954_p3 = por %p46_p2, %p45_p1 }
   0xd   : > { %p31_p4 = scmp.ge.s32.totalorder %s1168_s17, 2  ;;  %p51_p5 = scmp.ne.s32.totalorder %s854_s7, %s850_s6 }
   0xe   : > { %p52_p6 = scmp.eq.s32.totalorder %s647_s14, 0  ;;  %p77_p7 = scmp.eq.s32.totalorder %s647_s14, 5 }
   0xf   : > { %s1170_s17 = smov (%p31_p4, %s1168_s17), 0  ;;  %p83_p10 = scmp.eq.s32.totalorder %s648_s15, 5 }
  0x10   : > { %p962_p8 = por %p52_p6, %p51_p5  ;;  %p966_p9 = por %p77_p7, %p45_p1 }
  0x11   : > { %s33_s23 = ssub.s32 %s874_s12, %s1170_s17  ;;  %p972_p12 = por %p83_p10, %p51_p5 }
  0x12   : > { %s1153_s22 = scalar_select %p966_p9, 1, 0 }
  0x13   : > { %s35_s24 = sor.u32 %s34_s19, %s33_s23  ;;  %p674_p13 = scmp.lt.s32.totalorder %s878_s13, 6 }
  0x14   : > { %p36_p11 = scmp.eq.s32.totalorder %s35_s24, 0  ;;  %s103_s26 = sand.u32 1, %s858_s8  }
  0x15   : > { %s1154_s25 = scalar_select %p972_p12, 1, 0 }
  0x16   : > { %s979_s27 = scalar_select %p36_p11, %s858_s8, %s38_s18  }
  0x17   : > { %s656_s28 = smul.u32 24, %s103_s26  ;;  %p984_p0 = pnand %p674_p13, %p954_p3 }
  0x18   : > { %s657_s29 = smul.u32 3, %s870_s11  ;;  %s996_s20 = scalar_lea.sflag [#allocation3], %s103_s26 }
  0x19   : > { %s658_s2 = smul.u32 9, %s874_s12  ;;  %s107_s3 = scalar_lea.vmem [#allocation2], %s656_s28 }
  0x1a   : > { %s116_s4 = sshll.u32 %s107_s3, 4  ;;  %p752_p2 = pneg %p984_p0  ;;  %s989_s4 = int_to_ptr.vmem [resolvable:$true] %s116_s4 }
  0x1b   : > { %s113_s5 = sadd.s32 %s658_s2, %s657_s29  ;;  %s755_s29 = scalar_lea.hbm %s1148_s0, 2304 }
  0x1c   : > { %s651_s14 = sshll.u32 %s113_s5, 7 }
  0x1d   : > { %s994_s18 = scalar_lea.hbm %s1148_s0, %s651_s14 }
  0x1e   : > { %s750_s23 = scalar_lea.hbm %s994_s18, 384  ;;  %p756_p5 = scmp.lt.u32.totalorder %s994_s18, %s1148_s0 }
  0x1f   : > { %p751_p1 = scmp.ne.s32.totalorder %s994_s18, %s750_s23  ;;  %p757_p6 = scmp.lt.u32.totalorder %s755_s29, %s750_s23 }
  0x20   : > { %p759_p10 = scmp.lt.u32.totalorder %s750_s23, %s994_s18 }
  0x21   : > { %p753_p3 = pnand %p752_p2, %p751_p1  ;;  %p758_p7 = por %p757_p6, %p756_p5 }
  0x23   : > { %p754_p4 = pneg %p753_p3  ;;  %p760_p11 = por %p759_p10, %p758_p7 }
  0x25   : > { %p761_p13 = pnand %p760_p11, %p754_p4 }
  0x27   : > { %764 = shalt.err (!%p761_p13)
}
  0x28   : > { %s765_s26 = scalar_lea.vmem %s989_s4, 384  ;;  %s880_s5 = smov [#allocation2]  }
  0x29   : > { %p766_p1 = scmp.ne.s32.totalorder %s989_s4, %s765_s26  ;;  %s770_s14 = sshll.u32 %s880_s5, 4  ;;  %s771_s14 = int_to_ptr.vmem [resolvable:$false] %s770_s14 }
  0x2a   : > { %s772_s15 = scalar_lea.vmem %s771_s14, 768  ;;  %p773_p9 = scmp.lt.s32.totalorder %s989_s4, %s771_s14 }
  0x2b   : > { %p768_p3 = pnand %p766_p1, %p752_p2  ;;  %p774_p5 = scmp.lt.s32.totalorder %s772_s15, %s765_s26 }
  0x2d   : > { %p769_p12 = pneg %p768_p3  ;;  %p775_p6 = por %p774_p5, %p773_p9 }
  0x2f   : > { %p776_p7 = pnand %p775_p6, %p769_p12 }
  0x31   : > { %779 = shalt.err (!%p776_p7)
}
  0x32   : > { %s881_s19 = smov 128   ;;  %s882_s23 = smov 8  }
  0x33   : > { %669 = dma.hbm_to_vmem [thread:$0]  (!%p984_p0), %s994_s18, 384, %s989_s4, %s996_s20, %s881_s19, %s881_s19, %s882_s23  }
  0x34   : > { %p652_p2 = scmp.ge.s32.totalorder %s878_s13, 1  ;;  %p124_p4 = scmp.lt.s32.totalorder %s878_s13, 7 }
  0x36   : > { %p125_p10 = pnand %p652_p2, %p124_p4 }
  0x37   : > { %s1027_s24 = sand.u32 (!%p125_p10), 1, %s854_s7  }
  0x38   : > { %128 = sbr.rel (%p125_p10) target bundleno = 763 (0x2fb), region = 24  ;;  %s131_s29 = scalar_lea.sflag (!%p125_p10), [#allocation3], %s1027_s24 }
  0x39   : > { %s659_s28 = smul.u32 (!%p125_p10), 24, %s1027_s24 }
  0x3b   : > { %s1033_s2 = scalar_lea.vmem (!%p125_p10), [#allocation2], %s659_s28 }
  0x3f   : > { %841 = dma.done.wait (%p962_p8), %s131_s29, 384  }
  0x40   : > { %843 = vsyncadd (%p962_p8), %s131_s29, 4294966912  ;;  %v203_v0 = vld [vmem:[%s1033_s2 + $0x8] sm:$0xf]  ;;  %s883_s30 = smov 116   ;;  %s884_s4 = smov 120   ;;  %vm156_vm0 = vcmask 195584  }
  0x41   : > { %v160_v1 = vld [vmem:[%s1033_s2 + $0x8] sm:$0xf]  ;;  %205 = vrot.lane.b32.xlu1 %v203_v0, %s883_s30  ;;  %s885_s18 = smov 112   ;;  %v289_v3 = vld [vmem:[%s1033_s2 + $0xc] sm:$0xf]  ;;  %s886_s21 = smov 8  }
  0x42   : > { %162 = vrot.lane.b32.xlu0 %v160_v1, %s884_s4  ;;  %v246_v2 = vld [vmem:[%s1033_s2 + $0x8] sm:$0xf]  ;;  %v331_v8 = vld [vmem:[%s1033_s2 + $0xc] sm:$0xf]  ;;  %v415_v9 = vld [vmem:[%s1033_s2 + $0x10] sm:$0xf] }
  0x43   : > { %v457_v10 = vld [vmem:[%s1033_s2 + $0x10] sm:$0xf]  ;;  %v373_v11 = vld [vmem:[%s1033_s2 + $0xc] sm:$0xf]  ;;  %s887_s20 = smov 16   ;;  %v153_v22 = vld [vmem:[%s1033_s2] sm:$0xff] }
  0x44   : > { %v499_v12 = vld [vmem:[%s1033_s2 + $0x10] sm:$0xf]  ;;  %v154_v23 = vld [vmem:[%s1033_s2 + $0x8] sm:$0xff]  ;;  %s1054_s3 = scalar_lea.vmem [#allocation5], %s659_s28  ;;  %s888_s26 = smov 12   ;;  %vm201_vm1 = vcmask 93248  }
  0x45   : > { %248 = vrot.lane.b32.xlu1 %v246_v2, %s885_s18  ;;  %157 = vst.msk [vmem:[%s1054_s3] sm:$0xff] %vm156_vm0, %v153_v22  ;;  %158 = vst.msk [vmem:[%s1054_s3 + $0x8] sm:$0xff] %vm156_vm0, %v154_v23  ;;  %vm244_vm2 = vcmask 126048   ;;  %vm287_vm3 = vcmask 158848   ;;  %v155_v32 = vld [vmem:[%s1033_s2 + $0x10] sm:$0xff]  ;;  %s660_s5 = smul.u32 3, %s862_s9 }
  0x46   : > { %159 = vst.msk [vmem:[%s1054_s3 + $0x10] sm:$0xff] %vm156_vm0, %v155_v32  ;;  %s661_s14 = smul.u32 9, %s866_s10  ;;  %s557_s23 = sshll.u32 %s1054_s3, 4  ;;  %s1089_s23 = int_to_ptr.vmem [resolvable:$true] %s557_s23 }
  0x47   : > { %s542_s9 = scalar_lea.sflag [#allocation4], %s1027_s24  ;;  %s780_s10 = scalar_lea.vmem %s1089_s23, 384 }
  0x48   : > { %s554_s15 = sadd.s32 %s661_s14, %s660_s5  ;;  %p781_p8 = scmp.ne.s32.totalorder %s1089_s23, %s780_s10 }
  0x49   : > { %291 = vrot.lane.b32.xlu1 %v289_v3, %s884_s4  ;;  %s653_s19 = sshll.u32 %s554_s15, 7  ;;  %p1156_p9 = scmp.ne.s32.totalorder %s1153_s22, 0 }
  0x4a   : > { %s1087_s2 = scalar_lea.hbm %s1149_s1, %s653_s19 }
  0x4b   : > { %p782_p12 = pnand %p781_p8, %p1156_p9 }
  0x4d   : > { %p783_p0 = pneg %p782_p12 }
  0xb3   : > { %v206_v4 = vpop.permute.xlu1 %205 }
  0xb4   : > { %v163_v5 = vpop.permute.xlu0 %162  ;;  %208 = vxpose.xlu1.b32.start.end [1/1] (short) (narrow) %v206_v4, 8 }
  0xb5   : > { %165 = vxpose.xlu0.b32.start.end [1/1] (short) (narrow) %v163_v5, 8 }
  0xb7   : > { %v249_v6 = vpop.permute.xlu1 %248 }
  0xb9   : > { %251 = vxpose.xlu0.b32.start.end [1/1] (short) (narrow) %v249_v6, 8 }
  0xbb   : > { %v292_v7 = vpop.permute.xlu1 %291 }
  0xbc   : > { %294 = vxpose.xlu1.b32.start.end [1/1] (short) (narrow) %v292_v7, 8 }
  0xda   : > { %333 = vrot.lane.b32.xlu1 %v331_v8, %s883_s30 }
  0xde   : > { %417 = vrot.lane.b32.xlu1 %v415_v9, %s884_s4 }
  0xe2   : > { %459 = vrot.lane.b32.xlu1 %v457_v10, %s883_s30  ;;  %s889_s30 = smov [#allocation5]  }
  0xe3   : > { %s784_s4 = sshll.u32 %s889_s30, 4  ;;  %s785_s4 = int_to_ptr.vmem [resolvable:$false] %s784_s4 }
  0xe4   : > { %p787_p11 = scmp.lt.s32.totalorder %s1089_s23, %s785_s4 }
  0xe6   : > { %375 = vrot.lane.b32.xlu1 %v373_v11, %s885_s18 }
  0xea   : > { %501 = vrot.lane.b32.xlu1 %v499_v12, %s885_s18  ;;  %s786_s18 = scalar_lea.vmem %s785_s4, 768 }
  0xeb   : > { %p788_p13 = scmp.lt.s32.totalorder %s786_s18, %s780_s10 }
  0xed   : > { %p789_p1 = por %p788_p13, %p787_p11 }
  0xef   : > { %p790_p3 = pnand %p789_p1, %p783_p0 }
 0x134   : > { %v224_v15 = vpop.trf.xlu1 }
 0x135   : > { %v181_v13 = vpop.trf.xlu0 }
 0x136   : > { %198 = vrot.lane.b32.xlu1 %v181_v13, %s886_s21 }
 0x139   : > { %v267_v14 = vpop.trf.xlu0 }
 0x13a   : > { %284 = vrot.lane.b32.xlu1 %v267_v14, %s887_s20 }
 0x13c   : > { %v310_v16 = vpop.trf.xlu1 }
 0x14c   : > { %v334_v17 = vpop.permute.xlu1 %333 }
 0x14d   : > { %336 = vxpose.xlu0.b32.start.end [1/1] (short) (narrow) %v334_v17, 8 }
 0x150   : > { %v418_v18 = vpop.permute.xlu1 %417 }
 0x154   : > { %v460_v19 = vpop.permute.xlu1 %459 }
 0x158   : > { %v376_v20 = vpop.permute.xlu1 %375 }
 0x159   : > { %378 = vxpose.xlu0.b32.start.end [1/1] (short) (narrow) %v376_v20, 8 }
 0x15c   : > { %v502_v21 = vpop.permute.xlu1 %501 }
 0x15d   : > { %420 = vxpose.xlu0.b32.start.end [1/1] (short) (narrow) %v418_v18, 8 }
 0x161   : > { %504 = vxpose.xlu0.b32.start.end [1/1] (short) (narrow) %v502_v21, 8 }
 0x18a   : > { %241 = vrot.lane.b32.xlu0 %v224_v15, %s888_s26 }
 0x18e   : > { %327 = vrot.lane.b32.xlu0 %v310_v16, %s886_s21 }
 0x1a8   : > { %v199_v24 = vpop.permute.xlu1 %198 }
 0x1a9   : > { %202 = vst.msk [vmem:[%s1054_s3 + $0x8] sm:$0xf] %vm201_vm1, %v199_v24 }
 0x1ac   : > { %v285_v29 = vpop.permute.xlu1 %284 }
 0x1cd   : > { %v352_v25 = vpop.trf.xlu0 }
 0x1ce   : > { %369 = vrot.lane.b32.xlu1 %v352_v25, %s888_s26 }
 0x1d9   : > { %v394_v26 = vpop.trf.xlu0 }
 0x1dd   : > { %v436_v27 = vpop.trf.xlu0 }
 0x1de   : > { %453 = vrot.lane.b32.xlu0 %v436_v27, %s886_s21 }
 0x1e1   : > { %v520_v28 = vpop.trf.xlu0 }
 0x1e2   : > { %537 = vrot.lane.b32.xlu0 %v520_v28, %s887_s20 }
 0x1f7   : > { %462 = vxpose.xlu1.b32.start.end [1/1] (short) (narrow) %v460_v19, 8 }
 0x1fc   : > { %v242_v30 = vpop.permute.xlu0 %241 }
 0x1fd   : > { %245 = vst.msk [vmem:[%s1054_s3 + $0x8] sm:$0xf] %vm244_vm2, %v242_v30 }
 0x1fe   : > { %288 = vst.msk [vmem:[%s1054_s3 + $0x8] sm:$0xf] %vm287_vm3, %v285_v29 }
 0x200   : > { %v328_v31 = vpop.permute.xlu0 %327 }
 0x201   : > { %330 = vst.msk [vmem:[%s1054_s3 + $0xc] sm:$0xf] %vm201_vm1, %v328_v31 }
 0x215   : > { %411 = vrot.lane.b32.xlu1 %v394_v26, %s887_s20 }
 0x240   : > { %v370_v33 = vpop.permute.xlu1 %369 }
 0x241   : > { %372 = vst.msk [vmem:[%s1054_s3 + $0xc] sm:$0xf] %vm244_vm2, %v370_v33 }
 0x250   : > { %v454_v34 = vpop.permute.xlu0 %453 }
 0x251   : > { %456 = vst.msk [vmem:[%s1054_s3 + $0x10] sm:$0xf] %vm201_vm1, %v454_v34 }
 0x254   : > { %v538_v37 = vpop.permute.xlu0 %537 }
 0x277   : > { %v478_v35 = vpop.trf.xlu1 }
 0x278   : > { %495 = vrot.lane.b32.xlu1 %v478_v35, %s888_s26 }
 0x287   : > { %v412_v36 = vpop.permute.xlu1 %411 }
 0x288   : > { %414 = vst.msk [vmem:[%s1054_s3 + $0xc] sm:$0xf] %vm287_vm3, %v412_v36 }
 0x2ea   : > { %v496_v38 = vpop.permute.xlu1 %495 }
 0x2eb   : > { %498 = vst.msk [vmem:[%s1054_s3 + $0x10] sm:$0xf] %vm244_vm2, %v496_v38 }
 0x2ec   : > { %540 = vst.msk [vmem:[%s1054_s3 + $0x10] sm:$0xf] %vm287_vm3, %v538_v37 }
 0x2ed   : > { %793 = shalt.err (!%p790_p3)
}
 0x2ee   : > { %s794_s20 = scalar_lea.hbm %s1087_s2, 384  ;;  %s798_s5 = scalar_lea.hbm %s1149_s1, 2304 }
 0x2ef   : > { %p795_p5 = scmp.ne.s32.totalorder %s1087_s2, %s794_s20  ;;  %p799_p2 = scmp.lt.u32.totalorder %s1087_s2, %s1149_s1 }
 0x2f0   : > { %p800_p4 = scmp.lt.u32.totalorder %s798_s5, %s794_s20  ;;  %p802_p8 = scmp.lt.u32.totalorder %s794_s20, %s1087_s2 }
 0x2f1   : > { %p796_p6 = pnand %p795_p5, %p1156_p9 }
 0x2f2   : > { %p801_p10 = por %p800_p4, %p799_p2 }
 0x2f3   : > { %p797_p7 = pneg %p796_p6 }
 0x2f4   : > { %p803_p12 = por %p802_p8, %p801_p10 }
 0x2f6   : > { %p804_p0 = pnand %p803_p12, %p797_p7 }
 0x2f8   : > { %807 = shalt.err (!%p804_p0)
}
 0x2f9   : > { %s890_s19 = smov 128  }
 0x2fa   : > { %664 = dma.vmem_to_hbm [thread:$0]  (%p1156_p9), %s1089_s23, 384, %s1087_s2, %s542_s9, %s890_s19, %s890_s19, %s886_s21  }
 0x2fb PF: > { %p675_p11 = scmp.ge.s32.totalorder %s878_s13, 2  ;;  %s572_s28 = sand.u32 1, %s850_s6  }
 0x2fc   : > { %p1157_p13 = scmp.ne.s32.totalorder %s1154_s25, 0  ;;  %s573_s29 = scalar_lea.sflag [#allocation4], %s572_s28 }
 0x2fe   : > { %p671_p1 = pnand %p675_p11, %p1157_p13 }
 0x300   : > { %845 = dma.done.wait (!%p671_p1), %s573_s29, 384  }
 0x301   : > { %847 = vsyncadd (!%p671_p1), %s573_s29, 4294966912  ;;  %s17_s13 = sadd.s32 1, %s878_s13   ;;  %s1158_s6 = smov %s854_s7 }
 0x302   : > { %p14_p3 = scmp.ge.s32.totalorder %s17_s13, 8   ;;  %s1159_s7 = smov %s858_s8 }
 0x303   : > { %s1160_s8 = smov %s979_s27  ;;  %s1161_s9 = smov %s870_s11 }
 0x304   : > { %s1162_s10 = smov %s874_s12  ;;  %s1163_s11 = smov %s1166_s16 }
 0x305   : > { %s1164_s12 = smov %s1170_s17  ;;  %16 = sbr.rel (!%p14_p3) target bundleno = 7 (0x7), region = 69 }
 0x30c   :  { %578 = vsyncpa [#allocation3], 1 }
 0x30d   :  { %580 = vsyncpa [#allocation3 + $0x1], 1 }
 0x30e   :  { %581 = vsyncpa [#allocation4], 1 }
 0x30f   :  { %583 = vsyncpa [#allocation4 + $0x1], 1 }

</bundles_post_ra>
